<compile_context>
chip_gen: v6e
topology: v6e:2x2x1
jax: 0.10.0
libtpu: 0.0.40
codegen_flags: <defaults>
</compile_context>

<pallas_src>
import functools

import jax
import jax.numpy as jnp
from jax.experimental import pallas as pl
from jax.experimental.pallas import tpu as pltpu  # noqa: F401  (kept for parity / future tiling)


# ------------------------------------------------------------------------------------
# Static helpers
# ------------------------------------------------------------------------------------

def buggy_reverse_perm(T):
    """Reproduce the exact index-swap loop in the PyTorch forward:
    swaps (i, T-1-i) for i, j in zip(range(0, T//2), range(T-1, T//2, -1)).
    Involution (applying it twice is identity)."""
    middle = T // 2
    perm = list(range(T))
    for i, j in zip(range(0, middle, 1), range(T - 1, middle, -1)):
        perm[i], perm[j] = perm[j], perm[i]
    return perm


def _fuse_gatewise(wl_t, wr_t, hidden):
    """wl_t, wr_t: (din, 4H) with PyTorch gate column order [i|f|g|o].
    Returns the (2*din, 8H) block-diagonal weight with column layout
    [i_L i_R | f_L f_R | g_L g_R | o_L o_R] (each block `hidden` wide)."""
    cols = []
    for k in range(4):
        wl_k = wl_t[:, k * hidden:(k + 1) * hidden]
        wr_k = wr_t[:, k * hidden:(k + 1) * hidden]
        cols.append(jnp.concatenate([wl_k, jnp.zeros_like(wr_k)], axis=0))
        cols.append(jnp.concatenate([jnp.zeros_like(wl_k), wr_k], axis=0))
    return jnp.concatenate(cols, axis=1)


def _fuse_biaswise(bl, br, hidden):
    """bl, br: (4H,) combined gate biases -> (8H,) in the fused column layout."""
    parts = []
    for k in range(4):
        parts.append(bl[k * hidden:(k + 1) * hidden])
        parts.append(br[k * hidden:(k + 1) * hidden])
    return jnp.concatenate(parts)


# ------------------------------------------------------------------------------------
# The single fused kernel: embed-gather + Linear+tanh + hoisted W_ih + bi-LSTM
# ------------------------------------------------------------------------------------

def _encoder_kernel(idx_ref, proj_ref, lb_ref, wih_ref, gb_ref, whh_ref, o_ref,
                    *, seq_len, batch, hidden, vocab_char, vocab_bichar, perm):
    T, B, H = seq_len, batch, hidden
    N = T * B
    V = vocab_char + vocab_bichar
    H2 = 2 * H            # fused hidden width  (left | right)
    G = 8 * H             # fused gate width

    # ----- in-kernel embedding gather as one-hot matmuls -----------------------------
    idx = idx_ref[...]                                            # (N, 4) int32
    lane_v = jax.lax.broadcasted_iota(jnp.int32, (N, V), 1)
    # columns of idx: 0=char(natural) 1=char(permuted) 2=bichar_left 3=bichar_right(perm)
    # Valid char indices < vocab_char, so the char hit lands in lanes [0, Vc) and the
    # bichar hit in lanes [Vc, V); each row has exactly two ones.
    cond_l = (lane_v == idx[:, 0:1]) | ((lane_v - vocab_char) == idx[:, 2:3])
    cond_r = (lane_v == idx[:, 1:2]) | ((lane_v - vocab_char) == idx[:, 3:4])
    oh_left = jnp.where(cond_l, 1.0, 0.0).astype(jnp.bfloat16)    # (N, V)
    oh_right = jnp.where(cond_r, 1.0, 0.0).astype(jnp.bfloat16)   # (N, V)

    # ----- Linear (folded into the tables) + tanh, hoisted W_ih projection ----------
    proj = proj_ref[...]                                          # (V, H)  bf16
    lb = lb_ref[...]                                              # (1, H)  f32
    pre_l = jnp.dot(oh_left, proj, preferred_element_type=jnp.float32) + lb
    pre_r = jnp.dot(oh_right, proj, preferred_element_type=jnp.float32) + lb
    x = jnp.concatenate([jnp.tanh(pre_l), jnp.tanh(pre_r)], axis=-1)        # (N, 2H)

    gx = jnp.dot(x.astype(jnp.bfloat16), wih_ref[...],
                 preferred_element_type=jnp.float32) + gb_ref[...]          # (N, 8H)

    # ----- lane-fused bidirectional LSTM recurrence ----------------------------------
    whh = whh_ref[...]                                            # (2H, 8H) bf16
    gate_lane = jax.lax.broadcasted_iota(jnp.int32, (B, G), 1)
    is_g = (gate_lane >= 4 * H) & (gate_lane < 6 * H)             # g-gate lanes (x2-scaled)

    h = jnp.zeros((B, H2), jnp.float32)
    c = jnp.zeros((B, H2), jnp.float32)
    h_steps = []
    for s in range(T):                                            # static unroll
        g_x = gx[s * B:(s + 1) * B, :]                            # (B, 8H) static slice
        if s == 0:
            gates = g_x                                           # h0 == 0
        else:
            gates = g_x + jnp.dot(h.astype(jnp.bfloat16), whh,
                                  preferred_element_type=jnp.float32)
        a = jax.nn.sigmoid(gates)                                 # single EUP pass
        acts = jnp.where(is_g, 2.0 * a - 1.0, a)                  # tanh(x) = 2*sigmoid(2x)-1
        i_g = acts[:, 0:H2]
        f_g = acts[:, H2:2 * H2]
        g_g = acts[:, 2 * H2:3 * H2]
        o_g = acts[:, 3 * H2:4 * H2]
        c = f_g * c + i_g * g_g
        h = o_g * jnp.tanh(c)
        h_steps.append(h)

    # ----- output assembly: static post-LSTM swap + single lane-dense store ----------
    half_mask = jax.lax.broadcasted_iota(jnp.int32, (B, H2), 1) < H
    pieces = []
    for t in range(T):
        pt = perm[t]
        if pt == t:
            pieces.append(h_steps[t])
        else:
            # lanes [0,H): left output at step t; lanes [H,2H): right output at step perm[t]
            pieces.append(jnp.where(half_mask, h_steps[t], h_steps[pt]))
    o_ref[...] = jnp.concatenate(pieces, axis=-1)                 # (B, 2*T*H)


# ------------------------------------------------------------------------------------
# Encoder module (parameters + wrapper)
# ------------------------------------------------------------------------------------

class EncoderPallas:
    def __init__(self, key, *, embed_char_num, embed_bichar_num,
                 static_embed_char_num, static_embed_bichar_num,
                 embed_char_dim, embed_bichar_dim, hidden_size, rnn_hidden_dim):
        # The PyTorch module's post-Linear .view(..., rnn_hidden_dim) requires this.
        assert hidden_size == rnn_hidden_dim
        self.embed_char_dim = embed_char_dim
        self.embed_bichar_dim = embed_bichar_dim
        self.hidden_size = hidden_size
        self.rnn_hidden_dim = rnn_hidden_dim
        self.input_dim = (embed_char_dim + embed_bichar_dim) * 2

        ks = jax.random.split(key, 14)
        s = 0.1
        self.char_embed = s * jax.random.normal(ks[0], (embed_char_num, embed_char_dim), jnp.float32)
        self.bichar_embed = s * jax.random.normal(ks[1], (embed_bichar_num, embed_bichar_dim), jnp.float32)
        self.static_char_embed = s * jax.random.normal(ks[2], (static_embed_char_num, embed_char_dim), jnp.float32)
        self.static_bichar_embed = s * jax.random.normal(ks[3], (static_embed_bichar_num, embed_bichar_dim), jnp.float32)

        # Linear(in=input_dim, out=hidden_size)
        self.lin_w = s * jax.random.normal(ks[4], (hidden_size, self.input_dim), jnp.float32)
        self.lin_b = s * jax.random.normal(ks[5], (hidden_size,), jnp.float32)

        # Two single-layer LSTMs: input_size=hidden_size, hidden=rnn_hidden_dim
        def lstm_params(k0, k1, k2, k3):
            return (
                s * jax.random.normal(k0, (4 * rnn_hidden_dim, hidden_size), jnp.float32),
                s * jax.random.normal(k1, (4 * rnn_hidden_dim, rnn_hidden_dim), jnp.float32),
                s * jax.random.normal(k2, (4 * rnn_hidden_dim,), jnp.float32),
                s * jax.random.normal(k3, (4 * rnn_hidden_dim,), jnp.float32),
            )

        self.lstm_left = lstm_params(ks[6], ks[7], ks[8], ks[9])
        self.lstm_right = lstm_params(ks[10], ks[11], ks[12], ks[13])

        # ------------------ one-time fused / folded parameters ------------------
        H = rnn_hidden_dim
        Dc, Db = embed_char_dim, embed_bichar_dim

        # Fold the Linear layer into the embedding tables (dropout is identity in eval,
        # so embed -> concat -> Linear is linear in the gathered rows):
        #   pre[n] = P_char[char_idx[n]] + P_bichar[bichar_idx[n]] + b
        lin_w_t = jnp.transpose(self.lin_w)                          # (input_dim, H)
        vc = min(embed_char_num, static_embed_char_num)              # valid indices are < both
        vb = min(embed_bichar_num, static_embed_bichar_num)
        p_char = jnp.concatenate(
            [self.char_embed[:vc], self.static_char_embed[:vc]], axis=1) @ lin_w_t[0:2 * Dc, :]
        p_bichar = jnp.concatenate(
            [self.bichar_embed[:vb], self.static_bichar_embed[:vb]], axis=1) @ lin_w_t[2 * Dc:2 * Dc + 2 * Db, :]
        self.vocab_char = vc
        self.vocab_bichar = vb
        self.proj_table = jnp.concatenate([p_char, p_bichar], axis=0).astype(jnp.bfloat16)  # (V, H)
        self.lin_b_row = self.lin_b.reshape(1, hidden_size)                                  # (1, H) f32

        # Lane-fused block-diagonal LSTM weights, gate-major column layout
        # [i_L i_R | f_L f_R | g_L g_R | o_L o_R]; g-gate columns pre-scaled by 2 so the
        # kernel can use a single sigmoid pass + VPU fixup (tanh(x) = 2*sigmoid(2x)-1).
        w_ih_l, w_hh_l, b_ih_l, b_hh_l = self.lstm_left
        w_ih_r, w_hh_r, b_ih_r, b_hh_r = self.lstm_right
        wih_f = _fuse_gatewise(jnp.transpose(w_ih_l), jnp.transpose(w_ih_r), H)   # (2H, 8H)
        whh_f = _fuse_gatewise(jnp.transpose(w_hh_l), jnp.transpose(w_hh_r), H)   # (2H, 8H)
        gb_f = _fuse_biaswise(b_ih_l + b_hh_l, b_ih_r + b_hh_r, H)                # (8H,)
        g_scale = jnp.ones((8 * H,), jnp.float32).at[4 * H:6 * H].set(2.0)
        self.wih_fused = (wih_f * g_scale[None, :]).astype(jnp.bfloat16)
        self.whh_fused = (whh_f * g_scale[None, :]).astype(jnp.bfloat16)
        self.gate_bias_fused = (gb_f * g_scale).reshape(1, 8 * H)                 # f32

    def __call__(self, char_idx, bichar_left_idx, bichar_right_idx):
        # char_idx / bichar_*_idx: int32 [B, T]
        B, T = char_idx.shape
        H = self.rnn_hidden_dim
        N = T * B

        perm = buggy_reverse_perm(T)
        perm_arr = jnp.asarray(perm, dtype=jnp.int32)

        # Tiny int32 index plumbing only (time-major + statically permuted right branch);
        # all float work happens inside the kernel.  dropout_embed / dropout: identity.
        char_t = jnp.transpose(char_idx)
        bl_t = jnp.transpose(bichar_left_idx)
        br_t = jnp.transpose(bichar_right_idx)
        char_pt = jnp.take(char_t, perm_arr, axis=0)
        br_pt = jnp.take(br_t, perm_arr, axis=0)
        idx_all = jnp.stack([char_t, char_pt, bl_t, br_pt], axis=-1).reshape(N, 4).astype(jnp.int32)

        kernel = functools.partial(
            _encoder_kernel,
            seq_len=T, batch=B, hidden=H,
            vocab_char=self.vocab_char, vocab_bichar=self.vocab_bichar,
            perm=tuple(perm))

        args = (idx_all, self.proj_table, self.lin_b_row,
                self.wih_fused, self.gate_bias_fused, self.whh_fused)

        def full2d(shape):
            return pl.BlockSpec(shape, lambda: (0, 0))

        out = pl.pallas_call(
            kernel,
            out_shape=jax.ShapeDtypeStruct((B, T * 2 * H), jnp.float32),
            in_specs=[full2d(a.shape) for a in args],
            out_specs=pl.BlockSpec((B, T * 2 * H), lambda: (0, 0)),
        )(*args)

        return out.reshape(B, T, 2 * H)


# --------------------------- pure-JAX reference (for checking) ---------------------------

def reference_forward(enc, char_idx, bl_idx, br_idx):
    B, T = char_idx.shape
    H = enc.rnn_hidden_dim
    char_f = enc.char_embed[char_idx]
    schar_f = enc.static_char_embed[char_idx]
    bl_f = enc.bichar_embed[bl_idx]
    sbl_f = enc.static_bichar_embed[bl_idx]
    br_f = enc.bichar_embed[br_idx]
    sbr_f = enc.static_bichar_embed[br_idx]
    left_cat = jnp.concatenate([char_f, schar_f, bl_f, sbl_f], axis=2).reshape(B * T, -1)
    right_cat = jnp.concatenate([char_f, schar_f, br_f, sbr_f], axis=2).reshape(B * T, -1)
    left_h = jnp.tanh(left_cat @ enc.lin_w.T + enc.lin_b).reshape(B, T, H)
    right_h = jnp.tanh(right_cat @ enc.lin_w.T + enc.lin_b).reshape(B, T, H)
    perm = jnp.asarray(buggy_reverse_perm(T), dtype=jnp.int32)
    left_tbh = jnp.transpose(left_h, (1, 0, 2))
    right_tbh = jnp.transpose(right_h[:, perm, :], (1, 0, 2))

    def run_lstm(x_tbh, params):
        w_ih, w_hh, b_ih, b_hh = params
        hh = w_hh.shape[1]

        def step(carry, x_t):
            h, c = carry
            gates = x_t @ w_ih.T + h @ w_hh.T + b_ih + b_hh
            i = jax.nn.sigmoid(gates[:, 0:hh])
            f = jax.nn.sigmoid(gates[:, hh:2 * hh])
            g = jnp.tanh(gates[:, 2 * hh:3 * hh])
            o = jax.nn.sigmoid(gates[:, 3 * hh:4 * hh])
            c2 = f * c + i * g
            h2 = o * jnp.tanh(c2)
            return (h2, c2), h2

        b = x_tbh.shape[1]
        init = (jnp.zeros((b, hh), jnp.float32), jnp.zeros((b, hh), jnp.float32))
        _, hs = jax.lax.scan(step, init, x_tbh)
        return hs

    lo = run_lstm(left_tbh, enc.lstm_left)
    ro = run_lstm(right_tbh, enc.lstm_right)
    ro = jnp.transpose(jnp.transpose(ro, (1, 0, 2))[:, perm, :], (1, 0, 2))
    return jnp.transpose(jnp.concatenate([lo, ro], axis=2), (1, 0, 2))


# ------------------------------------------ main ------------------------------------------

if __name__ == "__main__":
    B, T = 2, 8
    EMBED_CHAR_NUM = 20
    EMBED_BICHAR_NUM = 24
    STATIC_CHAR_NUM = 20
    STATIC_BICHAR_NUM = 24
    EMBED_CHAR_DIM = 16
    EMBED_BICHAR_DIM = 16
    HIDDEN_SIZE = 32          # == rnn_hidden_dim (required by the module's .view())
    RNN_HIDDEN_DIM = 32

    key = jax.random.PRNGKey(0)
    k_param, k_c, k_bl, k_br = jax.random.split(key, 4)

    enc = EncoderPallas(
        k_param,
        embed_char_num=EMBED_CHAR_NUM,
        embed_bichar_num=EMBED_BICHAR_NUM,
        static_embed_char_num=STATIC_CHAR_NUM,
        static_embed_bichar_num=STATIC_BICHAR_NUM,
        embed_char_dim=EMBED_CHAR_DIM,
        embed_bichar_dim=EMBED_BICHAR_DIM,
        hidden_size=HIDDEN_SIZE,
        rnn_hidden_dim=RNN_HIDDEN_DIM,
    )

    char_idx = jax.random.randint(k_c, (B, T), 0, EMBED_CHAR_NUM, dtype=jnp.int32)
    bichar_left_idx = jax.random.randint(k_bl, (B, T), 0, EMBED_BICHAR_NUM, dtype=jnp.int32)
    bichar_right_idx = jax.random.randint(k_br, (B, T), 0, EMBED_BICHAR_NUM, dtype=jnp.int32)

    fwd = jax.jit(lambda a, b, c: enc(a, b, c))
    out = jax.block_until_ready(fwd(char_idx, bichar_left_idx, bichar_right_idx))

    assert out.shape == (B, T, 2 * RNN_HIDDEN_DIM), out.shape
    assert out.dtype == jnp.float32
    assert bool(jnp.all(jnp.isfinite(out)))

    ref = jax.block_until_ready(
        reference_forward(enc, char_idx, bichar_left_idx, bichar_right_idx))
    max_err = float(jnp.max(jnp.abs(out - ref)))
    # bf16 MXU operands (f32 accumulation) -> slightly looser tolerance than pure f32.
    assert max_err < 2e-2, f"max abs err vs pure-JAX reference: {max_err}"

    print("KERNEL_OK")
</pallas_src>

<mosaic_0001>
module attributes {stable_mosaic.version = 11 : i64} {
  func.func @_encoder_kernel(%arg0: memref<16x4xi32, #tpu.memory_space<vmem>>, %arg1: memref<44x32xbf16, #tpu.memory_space<vmem>>, %arg2: memref<1x32xf32, #tpu.memory_space<vmem>>, %arg3: memref<64x256xbf16, #tpu.memory_space<vmem>>, %arg4: memref<1x256xf32, #tpu.memory_space<vmem>>, %arg5: memref<64x256xbf16, #tpu.memory_space<vmem>>, %arg6: memref<2x512xf32, #tpu.memory_space<vmem>>) attributes {dimension_semantics = [], scalar_prefetch = 0 : i64, scratch_operands = 0 : i64, tpu.core_type = #tpu.core_type<tc>} {
    %c0 = arith.constant 0 : index
    %c0_0 = arith.constant 0 : index
    %0 = vector.load %arg0[%c0, %c0_0] : memref<16x4xi32, #tpu.memory_space<vmem>>, vector<16x4xi32>
    %1 = tpu.iota {dimensions = array<i32: 1>} : vector<16x44xi32>
    %2 = vector.extract_strided_slice %0 {offsets = [0, 0], sizes = [16, 1], strides = [1, 1]} : vector<16x4xi32> to vector<16x1xi32>
    %3 = vector.broadcast %2 : vector<16x1xi32> to vector<16x44xi32>
    %4 = arith.cmpi eq, %1, %3 : vector<16x44xi32>
    %c20_i32 = arith.constant 20 : i32
    %5 = vector.broadcast %c20_i32 : i32 to vector<16x44xi32>
    %6 = arith.subi %1, %5 : vector<16x44xi32>
    %7 = vector.extract_strided_slice %0 {offsets = [0, 2], sizes = [16, 1], strides = [1, 1]} : vector<16x4xi32> to vector<16x1xi32>
    %8 = vector.broadcast %7 : vector<16x1xi32> to vector<16x44xi32>
    %9 = arith.cmpi eq, %6, %8 : vector<16x44xi32>
    %10 = arith.ori %4, %9 : vector<16x44xi1>
    %11 = vector.extract_strided_slice %0 {offsets = [0, 1], sizes = [16, 1], strides = [1, 1]} : vector<16x4xi32> to vector<16x1xi32>
    %12 = vector.broadcast %11 : vector<16x1xi32> to vector<16x44xi32>
    %13 = arith.cmpi eq, %1, %12 : vector<16x44xi32>
    %c20_i32_1 = arith.constant 20 : i32
    %14 = vector.broadcast %c20_i32_1 : i32 to vector<16x44xi32>
    %15 = arith.subi %1, %14 : vector<16x44xi32>
    %16 = vector.extract_strided_slice %0 {offsets = [0, 3], sizes = [16, 1], strides = [1, 1]} : vector<16x4xi32> to vector<16x1xi32>
    %17 = vector.broadcast %16 : vector<16x1xi32> to vector<16x44xi32>
    %18 = arith.cmpi eq, %15, %17 : vector<16x44xi32>
    %19 = arith.ori %13, %18 : vector<16x44xi1>
    %cst = arith.constant 1.000000e+00 : f32
    %cst_2 = arith.constant 0.000000e+00 : f32
    %20 = vector.broadcast %cst : f32 to vector<16x44xf32>
    %21 = vector.broadcast %cst_2 : f32 to vector<16x44xf32>
    %22 = arith.select %10, %20, %21 : vector<16x44xi1>, vector<16x44xf32>
    %23 = arith.truncf %22 : vector<16x44xf32> to vector<16x44xbf16>
    %cst_3 = arith.constant 1.000000e+00 : f32
    %cst_4 = arith.constant 0.000000e+00 : f32
    %24 = vector.broadcast %cst_3 : f32 to vector<16x44xf32>
    %25 = vector.broadcast %cst_4 : f32 to vector<16x44xf32>
    %26 = arith.select %19, %24, %25 : vector<16x44xi1>, vector<16x44xf32>
    %27 = arith.truncf %26 : vector<16x44xf32> to vector<16x44xbf16>
    %c0_5 = arith.constant 0 : index
    %c0_6 = arith.constant 0 : index
    %28 = vector.load %arg1[%c0_5, %c0_6] : memref<44x32xbf16, #tpu.memory_space<vmem>>, vector<44x32xbf16>
    %c0_7 = arith.constant 0 : index
    %c0_8 = arith.constant 0 : index
    %29 = vector.load %arg2[%c0_7, %c0_8] : memref<1x32xf32, #tpu.memory_space<vmem>>, vector<1x32xf32>
    %cst_9 = arith.constant dense<0.000000e+00> : vector<16x32xf32>
    %30 = tpu.matmul %23, %28, %cst_9 {dimension_numbers = #tpu.dot_dimension_numbers<[1], [0], [0], [1], [0, 0, 1, 1], [], []>} : vector<16x44xbf16>, vector<44x32xbf16>, vector<16x32xf32> -> vector<16x32xf32>
    %31 = vector.broadcast %29 : vector<1x32xf32> to vector<16x32xf32>
    %32 = arith.addf %30, %31 : vector<16x32xf32>
    %cst_10 = arith.constant dense<0.000000e+00> : vector<16x32xf32>
    %33 = tpu.matmul %27, %28, %cst_10 {dimension_numbers = #tpu.dot_dimension_numbers<[1], [0], [0], [1], [0, 0, 1, 1], [], []>} : vector<16x44xbf16>, vector<44x32xbf16>, vector<16x32xf32> -> vector<16x32xf32>
    %34 = vector.broadcast %29 : vector<1x32xf32> to vector<16x32xf32>
    %35 = arith.addf %33, %34 : vector<16x32xf32>
    %36 = math.tanh %32 : vector<16x32xf32>
    %37 = math.tanh %35 : vector<16x32xf32>
    %38 = tpu.concatenate %36, %37 in 1 : vector<16x32xf32>, vector<16x32xf32> -> vector<16x64xf32>
    %39 = arith.truncf %38 : vector<16x64xf32> to vector<16x64xbf16>
    %c0_11 = arith.constant 0 : index
    %c0_12 = arith.constant 0 : index
    %40 = vector.load %arg3[%c0_11, %c0_12] : memref<64x256xbf16, #tpu.memory_space<vmem>>, vector<64x256xbf16>
    %cst_13 = arith.constant dense<0.000000e+00> : vector<16x256xf32>
    %41 = tpu.matmul %39, %40, %cst_13 {dimension_numbers = #tpu.dot_dimension_numbers<[1], [0], [0], [1], [0, 0, 1, 1], [], []>} : vector<16x64xbf16>, vector<64x256xbf16>, vector<16x256xf32> -> vector<16x256xf32>
    %c0_14 = arith.constant 0 : index
    %c0_15 = arith.constant 0 : index
    %42 = vector.load %arg4[%c0_14, %c0_15] : memref<1x256xf32, #tpu.memory_space<vmem>>, vector<1x256xf32>
    %43 = vector.broadcast %42 : vector<1x256xf32> to vector<16x256xf32>
    %44 = arith.addf %41, %43 : vector<16x256xf32>
    %c0_16 = arith.constant 0 : index
    %c0_17 = arith.constant 0 : index
    %45 = vector.load %arg5[%c0_16, %c0_17] : memref<64x256xbf16, #tpu.memory_space<vmem>>, vector<64x256xbf16>
    %46 = tpu.iota {dimensions = array<i32: 1>} : vector<2x256xi32>
    %c128_i32 = arith.constant 128 : i32
    %47 = vector.broadcast %c128_i32 : i32 to vector<2x256xi32>
    %48 = arith.cmpi sge, %46, %47 : vector<2x256xi32>
    %c192_i32 = arith.constant 192 : i32
    %49 = vector.broadcast %c192_i32 : i32 to vector<2x256xi32>
    %50 = arith.cmpi slt, %46, %49 : vector<2x256xi32>
    %51 = arith.andi %48, %50 : vector<2x256xi1>
    %cst_18 = arith.constant 0.000000e+00 : f32
    %52 = vector.broadcast %cst_18 : f32 to vector<2x64xf32>
    %53 = vector.extract_strided_slice %44 {offsets = [0, 0], sizes = [2, 256], strides = [1, 1]} : vector<16x256xf32> to vector<2x256xf32>
    %54 = arith.negf %53 : vector<2x256xf32>
    %55 = math.exp %54 : vector<2x256xf32>
    %cst_19 = arith.constant 1.000000e+00 : f32
    %56 = vector.broadcast %cst_19 : f32 to vector<2x256xf32>
    %57 = arith.addf %56, %55 : vector<2x256xf32>
    %58 = arith.divf %56, %57 : vector<2x256xf32>
    %cst_20 = arith.constant 2.000000e+00 : f32
    %59 = vector.broadcast %cst_20 : f32 to vector<2x256xf32>
    %60 = arith.mulf %59, %58 : vector<2x256xf32>
    %cst_21 = arith.constant 1.000000e+00 : f32
    %61 = vector.broadcast %cst_21 : f32 to vector<2x256xf32>
    %62 = arith.subf %60, %61 : vector<2x256xf32>
    %63 = arith.select %51, %62, %58 : vector<2x256xi1>, vector<2x256xf32>
    %64 = vector.extract_strided_slice %63 {offsets = [0, 0], sizes = [2, 64], strides = [1, 1]} : vector<2x256xf32> to vector<2x64xf32>
    %65 = vector.extract_strided_slice %63 {offsets = [0, 64], sizes = [2, 64], strides = [1, 1]} : vector<2x256xf32> to vector<2x64xf32>
    %66 = vector.extract_strided_slice %63 {offsets = [0, 128], sizes = [2, 64], strides = [1, 1]} : vector<2x256xf32> to vector<2x64xf32>
    %67 = vector.extract_strided_slice %63 {offsets = [0, 192], sizes = [2, 64], strides = [1, 1]} : vector<2x256xf32> to vector<2x64xf32>
    %68 = arith.mulf %65, %52 : vector<2x64xf32>
    %69 = arith.mulf %64, %66 : vector<2x64xf32>
    %70 = arith.addf %68, %69 : vector<2x64xf32>
    %71 = math.tanh %70 : vector<2x64xf32>
    %72 = arith.mulf %67, %71 : vector<2x64xf32>
    %73 = vector.extract_strided_slice %44 {offsets = [2, 0], sizes = [2, 256], strides = [1, 1]} : vector<16x256xf32> to vector<2x256xf32>
    %74 = arith.truncf %72 : vector<2x64xf32> to vector<2x64xbf16>
    %cst_22 = arith.constant dense<0.000000e+00> : vector<2x256xf32>
    %75 = tpu.matmul %74, %45, %cst_22 {dimension_numbers = #tpu.dot_dimension_numbers<[1], [0], [0], [1], [0, 0, 1, 1], [], []>} : vector<2x64xbf16>, vector<64x256xbf16>, vector<2x256xf32> -> vector<2x256xf32>
    %76 = arith.addf %73, %75 : vector<2x256xf32>
    %77 = arith.negf %76 : vector<2x256xf32>
    %78 = math.exp %77 : vector<2x256xf32>
    %cst_23 = arith.constant 1.000000e+00 : f32
    %79 = vector.broadcast %cst_23 : f32 to vector<2x256xf32>
    %80 = arith.addf %79, %78 : vector<2x256xf32>
    %81 = arith.divf %79, %80 : vector<2x256xf32>
    %cst_24 = arith.constant 2.000000e+00 : f32
    %82 = vector.broadcast %cst_24 : f32 to vector<2x256xf32>
    %83 = arith.mulf %82, %81 : vector<2x256xf32>
    %cst_25 = arith.constant 1.000000e+00 : f32
    %84 = vector.broadcast %cst_25 : f32 to vector<2x256xf32>
    %85 = arith.subf %83, %84 : vector<2x256xf32>
    %86 = arith.select %51, %85, %81 : vector<2x256xi1>, vector<2x256xf32>
    %87 = vector.extract_strided_slice %86 {offsets = [0, 0], sizes = [2, 64], strides = [1, 1]} : vector<2x256xf32> to vector<2x64xf32>
    %88 = vector.extract_strided_slice %86 {offsets = [0, 64], sizes = [2, 64], strides = [1, 1]} : vector<2x256xf32> to vector<2x64xf32>
    %89 = vector.extract_strided_slice %86 {offsets = [0, 128], sizes = [2, 64], strides = [1, 1]} : vector<2x256xf32> to vector<2x64xf32>
    %90 = vector.extract_strided_slice %86 {offsets = [0, 192], sizes = [2, 64], strides = [1, 1]} : vector<2x256xf32> to vector<2x64xf32>
    %91 = arith.mulf %88, %70 : vector<2x64xf32>
    %92 = arith.mulf %87, %89 : vector<2x64xf32>
    %93 = arith.addf %91, %92 : vector<2x64xf32>
    %94 = math.tanh %93 : vector<2x64xf32>
    %95 = arith.mulf %90, %94 : vector<2x64xf32>
    %96 = vector.extract_strided_slice %44 {offsets = [4, 0], sizes = [2, 256], strides = [1, 1]} : vector<16x256xf32> to vector<2x256xf32>
    %97 = arith.truncf %95 : vector<2x64xf32> to vector<2x64xbf16>
    %cst_26 = arith.constant dense<0.000000e+00> : vector<2x256xf32>
    %98 = tpu.matmul %97, %45, %cst_26 {dimension_numbers = #tpu.dot_dimension_numbers<[1], [0], [0], [1], [0, 0, 1, 1], [], []>} : vector<2x64xbf16>, vector<64x256xbf16>, vector<2x256xf32> -> vector<2x256xf32>
    %99 = arith.addf %96, %98 : vector<2x256xf32>
    %100 = arith.negf %99 : vector<2x256xf32>
    %101 = math.exp %100 : vector<2x256xf32>
    %cst_27 = arith.constant 1.000000e+00 : f32
    %102 = vector.broadcast %cst_27 : f32 to vector<2x256xf32>
    %103 = arith.addf %102, %101 : vector<2x256xf32>
    %104 = arith.divf %102, %103 : vector<2x256xf32>
    %cst_28 = arith.constant 2.000000e+00 : f32
    %105 = vector.broadcast %cst_28 : f32 to vector<2x256xf32>
    %106 = arith.mulf %105, %104 : vector<2x256xf32>
    %cst_29 = arith.constant 1.000000e+00 : f32
    %107 = vector.broadcast %cst_29 : f32 to vector<2x256xf32>
    %108 = arith.subf %106, %107 : vector<2x256xf32>
    %109 = arith.select %51, %108, %104 : vector<2x256xi1>, vector<2x256xf32>
    %110 = vector.extract_strided_slice %109 {offsets = [0, 0], sizes = [2, 64], strides = [1, 1]} : vector<2x256xf32> to vector<2x64xf32>
    %111 = vector.extract_strided_slice %109 {offsets = [0, 64], sizes = [2, 64], strides = [1, 1]} : vector<2x256xf32> to vector<2x64xf32>
    %112 = vector.extract_strided_slice %109 {offsets = [0, 128], sizes = [2, 64], strides = [1, 1]} : vector<2x256xf32> to vector<2x64xf32>
    %113 = vector.extract_strided_slice %109 {offsets = [0, 192], sizes = [2, 64], strides = [1, 1]} : vector<2x256xf32> to vector<2x64xf32>
    %114 = arith.mulf %111, %93 : vector<2x64xf32>
    %115 = arith.mulf %110, %112 : vector<2x64xf32>
    %116 = arith.addf %114, %115 : vector<2x64xf32>
    %117 = math.tanh %116 : vector<2x64xf32>
    %118 = arith.mulf %113, %117 : vector<2x64xf32>
    %119 = vector.extract_strided_slice %44 {offsets = [6, 0], sizes = [2, 256], strides = [1, 1]} : vector<16x256xf32> to vector<2x256xf32>
    %120 = arith.truncf %118 : vector<2x64xf32> to vector<2x64xbf16>
    %cst_30 = arith.constant dense<0.000000e+00> : vector<2x256xf32>
    %121 = tpu.matmul %120, %45, %cst_30 {dimension_numbers = #tpu.dot_dimension_numbers<[1], [0], [0], [1], [0, 0, 1, 1], [], []>} : vector<2x64xbf16>, vector<64x256xbf16>, vector<2x256xf32> -> vector<2x256xf32>
    %122 = arith.addf %119, %121 : vector<2x256xf32>
    %123 = arith.negf %122 : vector<2x256xf32>
    %124 = math.exp %123 : vector<2x256xf32>
    %cst_31 = arith.constant 1.000000e+00 : f32
    %125 = vector.broadcast %cst_31 : f32 to vector<2x256xf32>
    %126 = arith.addf %125, %124 : vector<2x256xf32>
    %127 = arith.divf %125, %126 : vector<2x256xf32>
    %cst_32 = arith.constant 2.000000e+00 : f32
    %128 = vector.broadcast %cst_32 : f32 to vector<2x256xf32>
    %129 = arith.mulf %128, %127 : vector<2x256xf32>
    %cst_33 = arith.constant 1.000000e+00 : f32
    %130 = vector.broadcast %cst_33 : f32 to vector<2x256xf32>
    %131 = arith.subf %129, %130 : vector<2x256xf32>
    %132 = arith.select %51, %131, %127 : vector<2x256xi1>, vector<2x256xf32>
    %133 = vector.extract_strided_slice %132 {offsets = [0, 0], sizes = [2, 64], strides = [1, 1]} : vector<2x256xf32> to vector<2x64xf32>
    %134 = vector.extract_strided_slice %132 {offsets = [0, 64], sizes = [2, 64], strides = [1, 1]} : vector<2x256xf32> to vector<2x64xf32>
    %135 = vector.extract_strided_slice %132 {offsets = [0, 128], sizes = [2, 64], strides = [1, 1]} : vector<2x256xf32> to vector<2x64xf32>
    %136 = vector.extract_strided_slice %132 {offsets = [0, 192], sizes = [2, 64], strides = [1, 1]} : vector<2x256xf32> to vector<2x64xf32>
    %137 = arith.mulf %134, %116 : vector<2x64xf32>
    %138 = arith.mulf %133, %135 : vector<2x64xf32>
    %139 = arith.addf %137, %138 : vector<2x64xf32>
    %140 = math.tanh %139 : vector<2x64xf32>
    %141 = arith.mulf %136, %140 : vector<2x64xf32>
    %142 = vector.extract_strided_slice %44 {offsets = [8, 0], sizes = [2, 256], strides = [1, 1]} : vector<16x256xf32> to vector<2x256xf32>
    %143 = arith.truncf %141 : vector<2x64xf32> to vector<2x64xbf16>
    %cst_34 = arith.constant dense<0.000000e+00> : vector<2x256xf32>
    %144 = tpu.matmul %143, %45, %cst_34 {dimension_numbers = #tpu.dot_dimension_numbers<[1], [0], [0], [1], [0, 0, 1, 1], [], []>} : vector<2x64xbf16>, vector<64x256xbf16>, vector<2x256xf32> -> vector<2x256xf32>
    %145 = arith.addf %142, %144 : vector<2x256xf32>
    %146 = arith.negf %145 : vector<2x256xf32>
    %147 = math.exp %146 : vector<2x256xf32>
    %cst_35 = arith.constant 1.000000e+00 : f32
    %148 = vector.broadcast %cst_35 : f32 to vector<2x256xf32>
    %149 = arith.addf %148, %147 : vector<2x256xf32>
    %150 = arith.divf %148, %149 : vector<2x256xf32>
    %cst_36 = arith.constant 2.000000e+00 : f32
    %151 = vector.broadcast %cst_36 : f32 to vector<2x256xf32>
    %152 = arith.mulf %151, %150 : vector<2x256xf32>
    %cst_37 = arith.constant 1.000000e+00 : f32
    %153 = vector.broadcast %cst_37 : f32 to vector<2x256xf32>
    %154 = arith.subf %152, %153 : vector<2x256xf32>
    %155 = arith.select %51, %154, %150 : vector<2x256xi1>, vector<2x256xf32>
    %156 = vector.extract_strided_slice %155 {offsets = [0, 0], sizes = [2, 64], strides = [1, 1]} : vector<2x256xf32> to vector<2x64xf32>
    %157 = vector.extract_strided_slice %155 {offsets = [0, 64], sizes = [2, 64], strides = [1, 1]} : vector<2x256xf32> to vector<2x64xf32>
    %158 = vector.extract_strided_slice %155 {offsets = [0, 128], sizes = [2, 64], strides = [1, 1]} : vector<2x256xf32> to vector<2x64xf32>
    %159 = vector.extract_strided_slice %155 {offsets = [0, 192], sizes = [2, 64], strides = [1, 1]} : vector<2x256xf32> to vector<2x64xf32>
    %160 = arith.mulf %157, %139 : vector<2x64xf32>
    %161 = arith.mulf %156, %158 : vector<2x64xf32>
    %162 = arith.addf %160, %161 : vector<2x64xf32>
    %163 = math.tanh %162 : vector<2x64xf32>
    %164 = arith.mulf %159, %163 : vector<2x64xf32>
    %165 = vector.extract_strided_slice %44 {offsets = [10, 0], sizes = [2, 256], strides = [1, 1]} : vector<16x256xf32> to vector<2x256xf32>
    %166 = arith.truncf %164 : vector<2x64xf32> to vector<2x64xbf16>
    %cst_38 = arith.constant dense<0.000000e+00> : vector<2x256xf32>
    %167 = tpu.matmul %166, %45, %cst_38 {dimension_numbers = #tpu.dot_dimension_numbers<[1], [0], [0], [1], [0, 0, 1, 1], [], []>} : vector<2x64xbf16>, vector<64x256xbf16>, vector<2x256xf32> -> vector<2x256xf32>
    %168 = arith.addf %165, %167 : vector<2x256xf32>
    %169 = arith.negf %168 : vector<2x256xf32>
    %170 = math.exp %169 : vector<2x256xf32>
    %cst_39 = arith.constant 1.000000e+00 : f32
    %171 = vector.broadcast %cst_39 : f32 to vector<2x256xf32>
    %172 = arith.addf %171, %170 : vector<2x256xf32>
    %173 = arith.divf %171, %172 : vector<2x256xf32>
    %cst_40 = arith.constant 2.000000e+00 : f32
    %174 = vector.broadcast %cst_40 : f32 to vector<2x256xf32>
    %175 = arith.mulf %174, %173 : vector<2x256xf32>
    %cst_41 = arith.constant 1.000000e+00 : f32
    %176 = vector.broadcast %cst_41 : f32 to vector<2x256xf32>
    %177 = arith.subf %175, %176 : vector<2x256xf32>
    %178 = arith.select %51, %177, %173 : vector<2x256xi1>, vector<2x256xf32>
    %179 = vector.extract_strided_slice %178 {offsets = [0, 0], sizes = [2, 64], strides = [1, 1]} : vector<2x256xf32> to vector<2x64xf32>
    %180 = vector.extract_strided_slice %178 {offsets = [0, 64], sizes = [2, 64], strides = [1, 1]} : vector<2x256xf32> to vector<2x64xf32>
    %181 = vector.extract_strided_slice %178 {offsets = [0, 128], sizes = [2, 64], strides = [1, 1]} : vector<2x256xf32> to vector<2x64xf32>
    %182 = vector.extract_strided_slice %178 {offsets = [0, 192], sizes = [2, 64], strides = [1, 1]} : vector<2x256xf32> to vector<2x64xf32>
    %183 = arith.mulf %180, %162 : vector<2x64xf32>
    %184 = arith.mulf %179, %181 : vector<2x64xf32>
    %185 = arith.addf %183, %184 : vector<2x64xf32>
    %186 = math.tanh %185 : vector<2x64xf32>
    %187 = arith.mulf %182, %186 : vector<2x64xf32>
    %188 = vector.extract_strided_slice %44 {offsets = [12, 0], sizes = [2, 256], strides = [1, 1]} : vector<16x256xf32> to vector<2x256xf32>
    %189 = arith.truncf %187 : vector<2x64xf32> to vector<2x64xbf16>
    %cst_42 = arith.constant dense<0.000000e+00> : vector<2x256xf32>
    %190 = tpu.matmul %189, %45, %cst_42 {dimension_numbers = #tpu.dot_dimension_numbers<[1], [0], [0], [1], [0, 0, 1, 1], [], []>} : vector<2x64xbf16>, vector<64x256xbf16>, vector<2x256xf32> -> vector<2x256xf32>
    %191 = arith.addf %188, %190 : vector<2x256xf32>
    %192 = arith.negf %191 : vector<2x256xf32>
    %193 = math.exp %192 : vector<2x256xf32>
    %cst_43 = arith.constant 1.000000e+00 : f32
    %194 = vector.broadcast %cst_43 : f32 to vector<2x256xf32>
    %195 = arith.addf %194, %193 : vector<2x256xf32>
    %196 = arith.divf %194, %195 : vector<2x256xf32>
    %cst_44 = arith.constant 2.000000e+00 : f32
    %197 = vector.broadcast %cst_44 : f32 to vector<2x256xf32>
    %198 = arith.mulf %197, %196 : vector<2x256xf32>
    %cst_45 = arith.constant 1.000000e+00 : f32
    %199 = vector.broadcast %cst_45 : f32 to vector<2x256xf32>
    %200 = arith.subf %198, %199 : vector<2x256xf32>
    %201 = arith.select %51, %200, %196 : vector<2x256xi1>, vector<2x256xf32>
    %202 = vector.extract_strided_slice %201 {offsets = [0, 0], sizes = [2, 64], strides = [1, 1]} : vector<2x256xf32> to vector<2x64xf32>
    %203 = vector.extract_strided_slice %201 {offsets = [0, 64], sizes = [2, 64], strides = [1, 1]} : vector<2x256xf32> to vector<2x64xf32>
    %204 = vector.extract_strided_slice %201 {offsets = [0, 128], sizes = [2, 64], strides = [1, 1]} : vector<2x256xf32> to vector<2x64xf32>
    %205 = vector.extract_strided_slice %201 {offsets = [0, 192], sizes = [2, 64], strides = [1, 1]} : vector<2x256xf32> to vector<2x64xf32>
    %206 = arith.mulf %203, %185 : vector<2x64xf32>
    %207 = arith.mulf %202, %204 : vector<2x64xf32>
    %208 = arith.addf %206, %207 : vector<2x64xf32>
    %209 = math.tanh %208 : vector<2x64xf32>
    %210 = arith.mulf %205, %209 : vector<2x64xf32>
    %211 = vector.extract_strided_slice %44 {offsets = [14, 0], sizes = [2, 256], strides = [1, 1]} : vector<16x256xf32> to vector<2x256xf32>
    %212 = arith.truncf %210 : vector<2x64xf32> to vector<2x64xbf16>
    %cst_46 = arith.constant dense<0.000000e+00> : vector<2x256xf32>
    %213 = tpu.matmul %212, %45, %cst_46 {dimension_numbers = #tpu.dot_dimension_numbers<[1], [0], [0], [1], [0, 0, 1, 1], [], []>} : vector<2x64xbf16>, vector<64x256xbf16>, vector<2x256xf32> -> vector<2x256xf32>
    %214 = arith.addf %211, %213 : vector<2x256xf32>
    %215 = arith.negf %214 : vector<2x256xf32>
    %216 = math.exp %215 : vector<2x256xf32>
    %cst_47 = arith.constant 1.000000e+00 : f32
    %217 = vector.broadcast %cst_47 : f32 to vector<2x256xf32>
    %218 = arith.addf %217, %216 : vector<2x256xf32>
    %219 = arith.divf %217, %218 : vector<2x256xf32>
    %cst_48 = arith.constant 2.000000e+00 : f32
    %220 = vector.broadcast %cst_48 : f32 to vector<2x256xf32>
    %221 = arith.mulf %220, %219 : vector<2x256xf32>
    %cst_49 = arith.constant 1.000000e+00 : f32
    %222 = vector.broadcast %cst_49 : f32 to vector<2x256xf32>
    %223 = arith.subf %221, %222 : vector<2x256xf32>
    %224 = arith.select %51, %223, %219 : vector<2x256xi1>, vector<2x256xf32>
    %225 = vector.extract_strided_slice %224 {offsets = [0, 0], sizes = [2, 64], strides = [1, 1]} : vector<2x256xf32> to vector<2x64xf32>
    %226 = vector.extract_strided_slice %224 {offsets = [0, 64], sizes = [2, 64], strides = [1, 1]} : vector<2x256xf32> to vector<2x64xf32>
    %227 = vector.extract_strided_slice %224 {offsets = [0, 128], sizes = [2, 64], strides = [1, 1]} : vector<2x256xf32> to vector<2x64xf32>
    %228 = vector.extract_strided_slice %224 {offsets = [0, 192], sizes = [2, 64], strides = [1, 1]} : vector<2x256xf32> to vector<2x64xf32>
    %229 = arith.mulf %226, %208 : vector<2x64xf32>
    %230 = arith.mulf %225, %227 : vector<2x64xf32>
    %231 = arith.addf %229, %230 : vector<2x64xf32>
    %232 = math.tanh %231 : vector<2x64xf32>
    %233 = arith.mulf %228, %232 : vector<2x64xf32>
    %234 = tpu.iota {dimensions = array<i32: 1>} : vector<2x64xi32>
    %c32_i32 = arith.constant 32 : i32
    %235 = vector.broadcast %c32_i32 : i32 to vector<2x64xi32>
    %236 = arith.cmpi slt, %234, %235 : vector<2x64xi32>
    %237 = arith.select %236, %72, %233 : vector<2x64xi1>, vector<2x64xf32>
    %238 = arith.select %236, %95, %210 : vector<2x64xi1>, vector<2x64xf32>
    %239 = arith.select %236, %118, %187 : vector<2x64xi1>, vector<2x64xf32>
    %240 = arith.select %236, %187, %118 : vector<2x64xi1>, vector<2x64xf32>
    %241 = arith.select %236, %210, %95 : vector<2x64xi1>, vector<2x64xf32>
    %242 = arith.select %236, %233, %72 : vector<2x64xi1>, vector<2x64xf32>
    %243 = tpu.concatenate %237, %238, %239, %141, %164, %240, %241, %242 in 1 : vector<2x64xf32>, vector<2x64xf32>, vector<2x64xf32>, vector<2x64xf32>, vector<2x64xf32>, vector<2x64xf32>, vector<2x64xf32>, vector<2x64xf32> -> vector<2x512xf32>
    %c0_50 = arith.constant 0 : index
    %c0_51 = arith.constant 0 : index
    %244 = vector.load %arg6[%c0_50, %c0_51] : memref<2x512xf32, #tpu.memory_space<vmem>>, vector<2x512xf32>
    tpu.vector_store %arg6[%c0_50, %c0_51], %243 {strides = array<i32>} : memref<2x512xf32, #tpu.memory_space<vmem>>, vector<2x512xf32>,
    return
  }
}

</mosaic_0001>

<bundles_post_ra>
// kernel: _lambda_.1
= control target key start
LH: loop header
LB: loop body
LE: loop exit
PB: predicated region body
PF: predicated region fallthrough
CT: control target
= control target key end

     0   :  { %v1313_v0 = vmov 3   ;;  %v1314_v1 = vmov 1   ;;  %vm105_vm0 = vcmask 1045504   ;;  %v1315_v5 = vmov 0.0   ;;  %s1658_s0 = inlined_call_operand.vmem [shape: s32[16,4], index: 0, kind: input, shape index: {}]   ;;  %s1659_s1 = inlined_call_operand.vmem [shape: bf16[44,32], index: 1, kind: input, shape index: {}]   ;;  %s1660_s3 = inlined_call_operand.vmem [shape: bf16[64,256], index: 3, kind: input, shape index: {}]   ;;  %s1661_s2 = inlined_call_operand.vmem [shape: f32[1,32], index: 2, kind: input, shape index: {}]   ;;  %s1662_s4 = inlined_call_operand.vmem [shape: f32[1,256], index: 4, kind: input, shape index: {}]   ;;  %s1663_s5 = inlined_call_operand.vmem [shape: bf16[64,256], index: 5, kind: input, shape index: {}]   ;;  %s1664_s6 = inlined_call_operand.vmem [shape: f32[2,512], index: 6, kind: output, shape index: {}]  }
   0x1   :  { %1187 = vset.pattern.permute.xlu1 %v1313_v0  ;;  %1186 = vset.pattern.permute.xlu0 %v1314_v1  ;;  %v24_v2 = vld [vmem:[%s1658_s0] sm:$0xff]  ;;  %v1198_v3 = vld [vmem:[%s1659_s1 + $0x10] sm:$0x3f]   ;;  %v25_v4 = vld [vmem:[%s1658_s0 + $0x8] sm:$0xff]  ;;  %vm1316_vm1 = vmmov 0   ;;  %v1317_v9 = vmov 0   ;;  %v26_v11 = vlaneseq }
   0x2   :  { %56 = vperm.xlu1 %1187, %v24_v2   ;;  %48 = vperm.xlu0 %1186, %v24_v2   ;;  %v107_v6 = vsel %vm105_vm0, %v1198_v3, 0  ;;  %v1199_v7 = vld [vmem:[%s1659_s1 + $0x8] sm:$0xff]   ;;  %v1200_v8 = vld [vmem:[%s1659_s1] sm:$0xff]   ;;  %v1318_v10 = vmov 2   ;;  %vm101_vm8 = vcmask 359424   ;;  %vm206_vm15 = vcmask 261120  }
   0x3   :  { %1167 = vmatprep.subr.bf16.mxu1 %v1315_v5  ;;  %1157 = vmatprep.subr.bf16.mxu0 %v1315_v5  ;;  %v1375_v12 = vand.u32 127, %v26_v11  ;;  %v1201_v28 = vld [vmem:[%s1660_s3 + $0x30] ss:$8 sps:$4 sm:$0xff]   ;;  %v1203_v29 = vld [vmem:[%s1660_s3 + $0x34] ss:$8 sps:$4 sm:$0xff]   ;;  %vm270_vm0 = vcmask 523264  }
   0x4   :  { %1168 = vmatpush3.bf16.msra.mxu1 %v107_v6  ;;  %1158 = vmatpush3.bf16.msra.mxu0 %v107_v6  ;;  %v1206_v30 = vld [vmem:[%s1660_s3 + $0x24] ss:$8 sps:$4 sm:$0xff]   ;;  %v1204_v31 = vld [vmem:[%s1660_s3 + $0x20] ss:$8 sps:$4 sm:$0xff]   ;;  %v1209_v32 = vld [vmem:[%s1660_s3 + $0x14] ss:$8 sps:$4 sm:$0xff]  }
   0x5   :  { %1169 = vmatprep.subr.bf16.mxu1 %v1315_v5  ;;  %1173 = vmatprep.mubr.msk.bf16.mxu1 %vm1316_vm1, %v1315_v5  ;;  %v1086_v13 = vadd.s32 4294967276, %v1375_v12  ;;  %v1207_v33 = vld [vmem:[%s1660_s3 + $0x10] ss:$8 sps:$4 sm:$0xff]   ;;  %v1087_v34 = vld [vmem:[%s1661_s2] ss:$0 sm:$0xff]  ;;  %s1319_s2 = smov 32  }
   0x6   :  { %59 = vperm.xlu1 %1187, %v25_v4   ;;  %51 = vperm.xlu0 %1186, %v25_v4   ;;  %v1212_v41 = vld [vmem:[%s1660_s3 + $0x4] ss:$8 sps:$4 sm:$0xff]   ;;  %v1210_v42 = vld [vmem:[%s1660_s3] ss:$8 sps:$4 sm:$0xff]   ;;  %v1416_v60 = vshrl.u32 %v26_v11, 7 }
   0x7   :  { %1159 = vmatprep.subr.bf16.mxu0 %v1315_v5  ;;  %1163 = vmatprep.mubr.msk.bf16.mxu0 %vm1316_vm1, %v1315_v5  ;;  %v218_v62 = vld [vmem:[%s1662_s4] sm:$0x3]  ;;  %s1320_s4 = smov 64  }
   0x8   :  { %1170 = vmatpush3.bf16.msra.mxu1 %v1199_v7  ;;  %1160 = vmatpush3.bf16.msra.mxu0 %v1199_v7  ;;  %v222_v61 = vsub.s32 0, %v1416_v60  ;;  %v226_v63 = vsub.s32 1, %v1416_v60 }
   0x9   :  { %1171 = vmatprep.subr.bf16.mxu1 %v1315_v5  ;;  %1161 = vmatprep.subr.bf16.mxu0 %v1315_v5 }
   0xa   :  { %1189 = vset.pattern.permute.xlu1 %v1317_v9  ;;  %1188 = vset.pattern.permute.xlu0 %v1317_v9  ;;  %v1423_v1 = vrot.slane %v218_v62, %v226_v63 }
   0xb   :  { %32 = vperm.xlu1 %1189, %v25_v4   ;;  %29 = vperm.xlu0 %1188, %v24_v2  }
   0xc   :  { %1172 = vmatpush3.bf16.msra.mxu1 %v1200_v8  ;;  %1162 = vmatpush3.bf16.msra.mxu0 %v1200_v8 }
   0xd   :  { %282 = vmatprep.subr.bf16.mxu0 %v1203_v29  ;;  %v1483_v29 = vld [vmem:[%s1663_s5 + $0x4] ss:$8 sps:$4 sm:$0xff]  }
   0xf   :  { %1190 = vset.pattern.permute.xlu1 %v1318_v10  ;;  %1191 = vset.pattern.permute.xlu0 %v1318_v10 }
  0x10   :  { %38 = vperm.xlu1 %1190, %v24_v2   ;;  %41 = vperm.xlu0 %1191, %v25_v4  }
  0x14   :  { %1197 = vset.pattern.permute.xlu0 %v1313_v0  ;;  %v223_v0 = vrot.slane %v218_v62, %v222_v61 }
  0x7d   :  { %v57_v14 = vpop.permute.xlu1 %56  ;;  %v49_v15 = vpop.permute.xlu0 %48 }
  0x7e   :  { %vm61_vm2 = vcmp.eq.s32.totalorder %v1086_v13, %v57_v14  ;;  %vm53_vm3 = vcmp.eq.s32.totalorder %v1375_v12, %v49_v15 }
  0x7f   :  { %vm63_vm4 = vmor %vm53_vm3, %vm61_vm2  ;;  %vm1000_vm2 = vcmp.lt.s32.totalorder %v1375_v12, 32 }
  0x80   :  { %v68_v18 = vsel %vm63_vm4, 1.0, %v1315_v5 }
  0x81   :  { %v60_v16 = vpop.permute.xlu1 %59  ;;  %v52_v17 = vpop.permute.xlu0 %51 }
  0x82   :  { %vm62_vm5 = vcmp.eq.s32.totalorder %v1086_v13, %v60_v16  ;;  %vm54_vm6 = vcmp.eq.s32.totalorder %v1375_v12, %v52_v17  ;;  %v1435_v16 = vadd.s32 128, %v1375_v12 }
  0x83   :  { %vm64_vm7 = vmor %vm54_vm6, %vm62_vm5 }
  0x84   :  { %v69_v19 = vsel %vm64_vm7, 1.0, %v1315_v5  ;;  %vm329_vm1 = vcmp.lt.s32.totalorder %v1435_v16, 192 }
  0x85   :  { %v70_v20 = vpack.c.bf16 %v69_v19, %v68_v18 }
  0x86   :  { %v33_v21 = vpop.permute.xlu1 %32  ;;  %v30_v22 = vpop.permute.xlu0 %29 }
  0x87   :  { %1174 = vmatmul.mubr.msk.bf16.vlgmr.msra.gmra.mxu1 %vm101_vm8, %v70_v20  ;;  %vm34_vm9 = vcmp.eq.s32.totalorder %v1375_v12, %v30_v22  ;;  %vm35_vm10 = vcmp.eq.s32.totalorder %v1375_v12, %v33_v21 }
  0x88   :  { %438 = vmatprep.mubr.bf16.mxu1 %v1317_v9 }
  0x8b   :  { %v39_v23 = vpop.permute.xlu1 %38  ;;  %v42_v24 = vpop.permute.xlu0 %41 }
  0x8c   :  { %vm43_vm11 = vcmp.eq.s32.totalorder %v1086_v13, %v39_v23  ;;  %vm44_vm12 = vcmp.eq.s32.totalorder %v1086_v13, %v42_v24  ;;  %v1444_v23 = vld [vmem:[%s1663_s5 + $0x34] ss:$8 sps:$4 sm:$0xff]   ;;  %v1449_v24 = vld [vmem:[%s1663_s5 + $0x30] ss:$8 sps:$4 sm:$0xff]  }
  0x8d   :  { %vm45_vm13 = vmor %vm34_vm9, %vm43_vm11  ;;  %414 = vmatprep.subr.bf16.mxu1 %v1444_v23 }
  0x8e   :  { %v65_v25 = vsel %vm45_vm13, 1.0, %v1315_v5  ;;  %vm46_vm14 = vmor %vm35_vm10, %vm44_vm12  ;;  %415 = vmatpush1.bf16.msra.mxu1 %v1449_v24 }
  0x8f   :  { %v66_v26 = vsel %vm46_vm14, 1.0, %v1315_v5 }
  0x90   :  { %v67_v27 = vpack.c.bf16 %v66_v26, %v65_v25  ;;  %v1455_v25 = vld [vmem:[%s1663_s5 + $0x24] ss:$8 sps:$4 sm:$0xff]   ;;  %v1462_v26 = vld [vmem:[%s1663_s5 + $0x20] ss:$8 sps:$4 sm:$0xff]  }
  0x91   :  { %416 = vmatprep.subr.bf16.mxu1 %v1455_v25 }
  0x92   :  { %1164 = vmatmul.mubr.msk.bf16.vlgmr.msra.gmra.mxu0 %vm101_vm8, %v67_v27  ;;  %v1469_v27 = vld [vmem:[%s1663_s5 + $0x14] ss:$8 sps:$4 sm:$0xff]   ;;  %417 = vmatpush1.bf16.msra.mxu1 %v1462_v26 }
  0x93   :  { %306 = vmatprep.mubr.bf16.mxu0 %v1317_v9  ;;  %283 = vmatpush1.bf16.msra.mxu0 %v1201_v28  ;;  %v1476_v28 = vld [vmem:[%s1663_s5 + $0x10] ss:$8 sps:$4 sm:$0xff]  }
  0x94   :  { %284 = vmatprep.subr.bf16.mxu0 %v1206_v30  ;;  %418 = vmatprep.subr.bf16.mxu1 %v1469_v27  ;;  %v1490_v30 = vld [vmem:[%s1663_s5] ss:$8 sps:$4 sm:$0xff]  }
  0x96   :  { %419 = vmatpush1.bf16.msra.mxu1 %v1476_v28 }
  0x97   :  { %285 = vmatpush1.bf16.msra.mxu0 %v1204_v31  ;;  %420 = vmatprep.subr.bf16.mxu1 %v1483_v29 }
  0x98   :  { %286 = vmatprep.subr.bf16.mxu0 %v1209_v32 }
  0x9a   :  { %421 = vmatpush1.bf16.msra.mxu1 %v1490_v30 }
  0x9b   :  { %287 = vmatpush1.bf16.msra.mxu0 %v1207_v33  ;;  %588 = vmatprep.subr.bf16.mxu1 %v1444_v23 }
  0x9c   :  { %288 = vmatprep.subr.bf16.mxu0 %v1212_v41 }
  0x9f   :  { %289 = vmatpush1.bf16.msra.mxu0 %v1210_v42 }
  0xa0   :  { %501 = vmatprep.subr.bf16.mxu0 %v1444_v23 }
 0x147   :  { %v187_v35 = vpop.f32.mrf.mxu1 }
 0x148   :  { %v188_v36 = vadd.f32 %v1087_v34, %v187_v35 }
 0x149   :  { %v1175_v37 = vpop.f32.mrf.mxu1 }
 0x14a   :  { %1225 = vtanh.f32 %v188_v36 }
 0x14b   :  { %v190_v38 = vpop.f32.mrf.mxu1 }
 0x14c   :  { %v191_v39 = vadd.f32 %v1087_v34, %v190_v38 }
 0x14d   :  { %v1176_v40 = vpop.f32.mrf.mxu1 }
 0x14e   :  { %1227 = vtanh.f32 %v191_v39 }
 0x152   :  { %v143_v43 = vpop.f32.mrf.mxu0 }
 0x153   :  { %v144_v44 = vadd.f32 %v1087_v34, %v143_v43 }
 0x154   :  { %v1165_v45 = vpop.f32.mrf.mxu0 }
 0x155   :  { %1229 = vtanh.f32 %v144_v44 }
 0x156   :  { %v146_v46 = vpop.f32.mrf.mxu0 }
 0x157   :  { %v147_v47 = vadd.f32 %v1087_v34, %v146_v46  ;;  %v1226_v49 = vpop.eup %1225 }
 0x158   :  { %v1166_v48 = vpop.f32.mrf.mxu0 }
 0x159   :  { %1231 = vtanh.f32 %v147_v47 }
 0x15b   :  { %v1228_v50 = vpop.eup %1227 }
 0x15c   :  { %v1192_v51 = vpack.i.bf16 %v1228_v50, %v1226_v49 }
 0x15e   :  { %1193 = vrot.lane.b32.xlu1 %v1192_v51, %s1319_s2 }
 0x162   :  { %v1230_v53 = vpop.eup %1229 }
 0x166   :  { %v1232_v56 = vpop.eup %1231 }
 0x1d0   :  { %v1194_v52 = vpop.permute.xlu1 %1193 }
 0x1d1   :  { %v1196_v54 = vunpack.i.h.bf16 %v1194_v52  ;;  %v1195_v55 = vunpack.i.l.bf16 %v1194_v52 }
 0x1d3   :  { %v207_v57 = vsel %vm206_vm15, %v1230_v53, %v1195_v55  ;;  %v208_v58 = vsel %vm206_vm15, %v1232_v56, %v1196_v54 }
 0x1d4   :  { %v209_v59 = vpack.c.bf16 %v208_v58, %v207_v57 }
 0x1d6   :  { %1101 = vmatmul.mubr.msk.bf16.vlgmr.msra.gmra.mxu0 %vm270_vm0, %v209_v59 }
 0x1d7   :  { %525 = vmatprep.mubr.bf16.mxu0 %v1317_v9  ;;  %502 = vmatpush1.bf16.msra.mxu0 %v1449_v24 }
 0x1d8   :  { %503 = vmatprep.subr.bf16.mxu0 %v1455_v25 }
 0x1db   :  { %504 = vmatpush1.bf16.msra.mxu0 %v1462_v26 }
 0x1dc   :  { %505 = vmatprep.subr.bf16.mxu0 %v1469_v27 }
 0x1df   :  { %506 = vmatpush1.bf16.msra.mxu0 %v1476_v28 }
 0x1e0   :  { %507 = vmatprep.subr.bf16.mxu0 %v1483_v29 }
 0x1e3   :  { %508 = vmatpush1.bf16.msra.mxu0 %v1490_v30 }
 0x1e4   :  { %675 = vmatprep.subr.bf16.mxu0 %v1444_v23 }
 0x296   :  { %v308_v2 = vpop.f32.mrf.mxu0 }
 0x297   :  { %v1425_v3 = vadd.f32 %v308_v2, %v223_v0 }
 0x298   :  { %v310_v4 = vpop.f32.mrf.mxu0 }
 0x299   :  { %v1428_v5 = vadd.f32 %v310_v4, %v1423_v1  ;;  %v1102_v6 = vmul.f32 -1.442695, %v1425_v3 }
 0x29a   :  { %v312_v7 = vpop.f32.mrf.mxu0 }
 0x29b   :  { %v1103_v8 = vmul.f32 -1.442695, %v1428_v5  ;;  %v1432_v10 = vadd.f32 %v312_v7, %v223_v0 }
 0x29c   :  { %v1534_v7 = vpop.f32.mrf.mxu0 }
 0x29d   :  { %1233 = vpow2.f32 %v1103_v8 }
 0x29e   :  { %1235 = vpow2.f32 %v1102_v6 }
 0x2aa   :  { %v1234_v11 = vpop.eup %1233 }
 0x2ab   :  { %v1236_v13 = vpop.eup %1235  ;;  %v339_v14 = vadd.f32 1.0, %v1234_v11 }
 0x2ac   :  { %v338_v15 = vadd.f32 1.0, %v1236_v13 }
 0x2ad   :  { %1237 = vrcp.f32 %v339_v14 }
 0x2ae   :  { %1239 = vrcp.f32 %v338_v15 }
 0x2ba   :  { %v1238_v17 = vpop.eup %1237 }
 0x2bb   :  { %v345_v18 = vmul.f32 2.0, %v1238_v17  ;;  %v1240_v20 = vpop.eup %1239 }
 0x2bc   :  { %v350_v31 = vmul.f32 0.0, %v1240_v20 }
 0x2bd   :  { %v1105_v19 = vadd.f32 -1.0, %v345_v18 }
 0x2bf   :  { %v349_v21 = vsel %vm329_vm1, %v1105_v19, %v1238_v17 }
 0x2c0   :  { %v351_v22 = vmul.f32 %v1240_v20, %v349_v21 }
 0x2c2   :  { %353 = vrot.lane.b32.xlu1 %v351_v22, %s1320_s4 }
 0x334   :  { %v354_v32 = vpop.permute.xlu1 %353 }
 0x335   :  { %v356_v33 = vadd.f32 %v354_v32, %v350_v31 }
 0x337   :  { %1241 = vtanh.f32 %v356_v33  ;;  %v474_v52 = vrot.slane %v356_v33, 6 }
 0x344   :  { %v1242_v34 = vpop.eup %1241 }
 0x345   :  { %v1499_v35 = vmul.f32 %v1242_v34, %v349_v21 }
 0x347   :  { %v359_v36 = vpack.c.bf16 %v1499_v35, %v1499_v35 }
 0x349   :  { %361 = vrot.lane.b32.xlu0 %v359_v36, %s1320_s4 }
 0x3bb   :  { %v362_v37 = vpop.permute.xlu0 %361 }
 0x3bc   :  { %1114 = vmatmul.mubr.msk.bf16.vlgmr.msra.gmra.mxu1 %vm270_vm0, %v362_v37 }
 0x3bd   :  { %589 = vmatpush1.bf16.msra.mxu1 %v1449_v24  ;;  %612 = vmatprep.mubr.bf16.mxu1 %v1317_v9 }
 0x3be   :  { %590 = vmatprep.subr.bf16.mxu1 %v1455_v25 }
 0x3c1   :  { %591 = vmatpush1.bf16.msra.mxu1 %v1462_v26 }
 0x3c2   :  { %592 = vmatprep.subr.bf16.mxu1 %v1469_v27 }
 0x3c5   :  { %593 = vmatpush1.bf16.msra.mxu1 %v1476_v28 }
 0x3c6   :  { %594 = vmatprep.subr.bf16.mxu1 %v1483_v29 }
 0x3c9   :  { %595 = vmatpush1.bf16.msra.mxu1 %v1490_v30 }
 0x3ca   :  { %755 = vmatprep.subr.bf16.mxu1 %v1444_v23 }
 0x47c   :  { %v440_v38 = vpop.f32.mrf.mxu1 }
 0x47d   :  { %v449_v39 = vrot.slane %v440_v38, 6 }
 0x47e   :  { %v442_v40 = vpop.f32.mrf.mxu1 }
 0x47f   :  { %v453_v41 = vadd.f32 %v449_v39, %v1425_v3  ;;  %v450_v42 = vrot.slane %v442_v40, 6 }
 0x480   :  { %v444_v43 = vpop.f32.mrf.mxu1 }
 0x481   :  { %v1115_v44 = vmul.f32 -1.442695, %v453_v41  ;;  %v454_v45 = vadd.f32 %v450_v42, %v1428_v5 }
 0x482   :  { %v445_v46 = vpop.f32.mrf.mxu1 }
 0x483   :  { %1243 = vpow2.f32 %v1115_v44  ;;  %v1116_v47 = vmul.f32 -1.442695, %v454_v45 }
 0x485   :  { %1245 = vpow2.f32 %v1116_v47 }
 0x490   :  { %v1244_v48 = vpop.eup %1243 }
 0x491   :  { %v461_v49 = vadd.f32 1.0, %v1244_v48 }
 0x492   :  { %v1246_v50 = vpop.eup %1245 }
 0x493   :  { %1247 = vrcp.f32 %v461_v49  ;;  %v462_v51 = vadd.f32 1.0, %v1246_v50 }
 0x495   :  { %1249 = vrcp.f32 %v462_v51 }
 0x4a0   :  { %v1248_v53 = vpop.eup %1247 }
 0x4a1   :  { %v476_v54 = vmul.f32 %v1248_v53, %v474_v52 }
 0x4a2   :  { %v1250_v55 = vpop.eup %1249 }
 0x4a3   :  { %v468_v56 = vmul.f32 2.0, %v1250_v55 }
 0x4a5   :  { %v1118_v57 = vadd.f32 -1.0, %v468_v56 }
 0x4a7   :  { %v472_v58 = vsel %vm329_vm1, %v1118_v57, %v1250_v55 }
 0x4a8   :  { %v477_v59 = vmul.f32 %v1248_v53, %v472_v58 }
 0x4aa   :  { %479 = vrot.lane.b32.xlu1 %v477_v59, %s1320_s4 }
 0x51c   :  { %v480_v61 = vpop.permute.xlu1 %479 }
 0x51d   :  { %v482_v62 = vadd.f32 %v480_v61, %v476_v54 }
 0x51f   :  { %1251 = vtanh.f32 %v482_v62  ;;  %v561_v34 = vrot.slane %v482_v62, 6 }
 0x52c   :  { %v1252_v63 = vpop.eup %1251 }
 0x52d   :  { %v1519_v0 = vmul.f32 %v1252_v63, %v472_v58 }
 0x52f   :  { %v485_v2 = vpack.c.bf16 %v1519_v0, %v1519_v0 }
 0x531   :  { %v487_v4 = vrot.slane %v485_v2, 1 }
 0x533   :  { %488 = vrot.lane.b32.xlu0 %v487_v4, %s1320_s4 }
 0x5a5   :  { %v489_v6 = vpop.permute.xlu0 %488 }
 0x5a6   :  { %1119 = vmatmul.mubr.msk.bf16.vlgmr.msra.gmra.mxu0 %vm270_vm0, %v489_v6 }
 0x5a7   :  { %676 = vmatpush1.bf16.msra.mxu0 %v1449_v24  ;;  %699 = vmatprep.mubr.bf16.mxu0 %v1317_v9 }
 0x5a8   :  { %677 = vmatprep.subr.bf16.mxu0 %v1455_v25 }
 0x5ab   :  { %678 = vmatpush1.bf16.msra.mxu0 %v1462_v26 }
 0x5ac   :  { %679 = vmatprep.subr.bf16.mxu0 %v1469_v27 }
 0x5af   :  { %680 = vmatpush1.bf16.msra.mxu0 %v1476_v28 }
 0x5b0   :  { %681 = vmatprep.subr.bf16.mxu0 %v1483_v29 }
 0x5b3   :  { %682 = vmatpush1.bf16.msra.mxu0 %v1490_v30 }
 0x5b4   :  { %842 = vmatprep.subr.bf16.mxu0 %v1444_v23 }
 0x666   :  { %v527_v8 = vpop.f32.mrf.mxu0 }
 0x667   :  { %v536_v11 = vrot.slane %v527_v8, 4 }
 0x668   :  { %v529_v13 = vpop.f32.mrf.mxu0 }
 0x669   :  { %v540_v14 = vadd.f32 %v536_v11, %v1425_v3  ;;  %v537_v15 = vrot.slane %v529_v13, 4 }
 0x66a   :  { %v531_v17 = vpop.f32.mrf.mxu0 }
 0x66b   :  { %v1120_v18 = vmul.f32 -1.442695, %v540_v14  ;;  %v541_v19 = vadd.f32 %v537_v15, %v1428_v5 }
 0x66c   :  { %v532_v20 = vpop.f32.mrf.mxu0 }
 0x66d   :  { %1253 = vpow2.f32 %v1120_v18  ;;  %v1121_v21 = vmul.f32 -1.442695, %v541_v19 }
 0x66f   :  { %1255 = vpow2.f32 %v1121_v21 }
 0x67a   :  { %v1254_v22 = vpop.eup %1253 }
 0x67b   :  { %v548_v31 = vadd.f32 1.0, %v1254_v22 }
 0x67c   :  { %v1256_v32 = vpop.eup %1255 }
 0x67d   :  { %1257 = vrcp.f32 %v548_v31  ;;  %v549_v33 = vadd.f32 1.0, %v1256_v32  ;;  %v1577_v31 = vadd.f32 %v1534_v7, %v1423_v1 }
 0x67f   :  { %1259 = vrcp.f32 %v549_v33 }
 0x68a   :  { %v1258_v36 = vpop.eup %1257 }
 0x68b   :  { %v563_v37 = vmul.f32 %v1258_v36, %v561_v34 }
 0x68c   :  { %v1260_v38 = vpop.eup %1259 }
 0x68d   :  { %v555_v39 = vmul.f32 2.0, %v1260_v38 }
 0x68f   :  { %v1123_v40 = vadd.f32 -1.0, %v555_v39 }
 0x691   :  { %v559_v41 = vsel %vm329_vm1, %v1123_v40, %v1260_v38 }
 0x692   :  { %v564_v42 = vmul.f32 %v1258_v36, %v559_v41 }
 0x694   :  { %566 = vrot.lane.b32.xlu1 %v564_v42, %s1320_s4 }
 0x706   :  { %v567_v43 = vpop.permute.xlu1 %566 }
 0x707   :  { %v569_v44 = vadd.f32 %v567_v43, %v563_v37 }
 0x709   :  { %1261 = vtanh.f32 %v569_v44 }
 0x716   :  { %v1262_v45 = vpop.eup %1261 }
 0x717   :  { %v1541_v46 = vmul.f32 %v1262_v45, %v559_v41 }
 0x719   :  { %v572_v47 = vpack.c.bf16 %v1541_v46, %v1541_v46 }
 0x71b   :  { %v574_v48 = vrot.slane %v572_v47, 2 }
 0x71d   :  { %575 = vrot.lane.b32.xlu0 %v574_v48, %s1320_s4 }
 0x78f   :  { %v576_v49 = vpop.permute.xlu0 %575 }
 0x790   :  { %1124 = vmatmul.mubr.msk.bf16.vlgmr.msra.gmra.mxu1 %vm270_vm0, %v576_v49 }
 0x791   :  { %756 = vmatpush1.bf16.msra.mxu1 %v1449_v24  ;;  %779 = vmatprep.mubr.bf16.mxu1 %v1317_v9 }
 0x792   :  { %757 = vmatprep.subr.bf16.mxu1 %v1455_v25 }
 0x795   :  { %758 = vmatpush1.bf16.msra.mxu1 %v1462_v26 }
 0x796   :  { %759 = vmatprep.subr.bf16.mxu1 %v1469_v27 }
 0x799   :  { %760 = vmatpush1.bf16.msra.mxu1 %v1476_v28 }
 0x79a   :  { %761 = vmatprep.subr.bf16.mxu1 %v1483_v29 }
 0x79d   :  { %762 = vmatpush1.bf16.msra.mxu1 %v1490_v30 }
 0x79e   :  { %929 = vmatprep.subr.bf16.mxu1 %v1444_v23  ;;  %v648_v23 = vrot.slane %v569_v44, 6 }
 0x850   :  { %v614_v50 = vpop.f32.mrf.mxu1 }
 0x851   :  { %v623_v51 = vrot.slane %v614_v50, 2 }
 0x852   :  { %v616_v52 = vpop.f32.mrf.mxu1 }
 0x853   :  { %v627_v53 = vadd.f32 %v623_v51, %v1425_v3  ;;  %v624_v54 = vrot.slane %v616_v52, 2 }
 0x854   :  { %v618_v55 = vpop.f32.mrf.mxu1 }
 0x855   :  { %v1125_v56 = vmul.f32 -1.442695, %v627_v53  ;;  %v628_v57 = vadd.f32 %v624_v54, %v1428_v5 }
 0x856   :  { %v619_v58 = vpop.f32.mrf.mxu1 }
 0x857   :  { %1263 = vpow2.f32 %v1125_v56  ;;  %v1126_v59 = vmul.f32 -1.442695, %v628_v57 }
 0x859   :  { %1265 = vpow2.f32 %v1126_v59 }
 0x864   :  { %v1264_v61 = vpop.eup %1263 }
 0x865   :  { %v635_v62 = vadd.f32 1.0, %v1264_v61 }
 0x866   :  { %v1266_v63 = vpop.eup %1265 }
 0x867   :  { %1267 = vrcp.f32 %v635_v62  ;;  %v636_v2 = vadd.f32 1.0, %v1266_v63 }
 0x869   :  { %1269 = vrcp.f32 %v636_v2 }
 0x874   :  { %v1268_v4 = vpop.eup %1267 }
 0x875   :  { %v650_v6 = vmul.f32 %v1268_v4, %v648_v23 }
 0x876   :  { %v1270_v8 = vpop.eup %1269 }
 0x877   :  { %v642_v3 = vmul.f32 2.0, %v1270_v8 }
 0x879   :  { %v1128_v11 = vadd.f32 -1.0, %v642_v3 }
 0x87b   :  { %v646_v13 = vsel %vm329_vm1, %v1128_v11, %v1270_v8 }
 0x87c   :  { %v651_v5 = vmul.f32 %v1268_v4, %v646_v13 }
 0x87e   :  { %653 = vrot.lane.b32.xlu1 %v651_v5, %s1320_s4 }
 0x8f0   :  { %v654_v14 = vpop.permute.xlu1 %653 }
 0x8f1   :  { %v656_v15 = vadd.f32 %v654_v14, %v650_v6 }
 0x8f3   :  { %1271 = vtanh.f32 %v656_v15  ;;  %v729_v44 = vrot.slane %v656_v15, 6 }
 0x900   :  { %v1272_v17 = vpop.eup %1271 }
 0x901   :  { %v1561_v18 = vmul.f32 %v1272_v17, %v646_v13 }
 0x903   :  { %v659_v19 = vpack.c.bf16 %v1561_v18, %v1561_v18 }
 0x905   :  { %v661_v20 = vrot.slane %v659_v19, 3 }
 0x907   :  { %662 = vrot.lane.b32.xlu0 %v661_v20, %s1320_s4 }
 0x979   :  { %v663_v21 = vpop.permute.xlu0 %662 }
 0x97a   :  { %1129 = vmatmul.mubr.msk.bf16.vlgmr.msra.gmra.mxu0 %vm270_vm0, %v663_v21 }
 0x97b   :  { %843 = vmatpush1.bf16.msra.mxu0 %v1449_v24  ;;  %866 = vmatprep.mubr.bf16.mxu0 %v1317_v9 }
 0x97c   :  { %844 = vmatprep.subr.bf16.mxu0 %v1455_v25 }
 0x97f   :  { %845 = vmatpush1.bf16.msra.mxu0 %v1462_v26 }
 0x980   :  { %846 = vmatprep.subr.bf16.mxu0 %v1469_v27 }
 0x983   :  { %847 = vmatpush1.bf16.msra.mxu0 %v1476_v28 }
 0x984   :  { %848 = vmatprep.subr.bf16.mxu0 %v1483_v29 }
 0x987   :  { %849 = vmatpush1.bf16.msra.mxu0 %v1490_v30 }
 0xa3a   :  { %v701_v22 = vpop.f32.mrf.mxu0 }
 0xa3b   :  { %v708_v32 = vadd.f32 %v701_v22, %v1432_v10 }
 0xa3c   :  { %v703_v33 = vpop.f32.mrf.mxu0 }
 0xa3d   :  { %v1130_v34 = vmul.f32 -1.442695, %v708_v32  ;;  %v709_v36 = vadd.f32 %v703_v33, %v1577_v31 }
 0xa3e   :  { %v705_v37 = vpop.f32.mrf.mxu0 }
 0xa3f   :  { %1273 = vpow2.f32 %v1130_v34  ;;  %v1131_v38 = vmul.f32 -1.442695, %v709_v36 }
 0xa40   :  { %v706_v39 = vpop.f32.mrf.mxu0 }
 0xa41   :  { %1275 = vpow2.f32 %v1131_v38 }
 0xa4c   :  { %v1274_v40 = vpop.eup %1273 }
 0xa4d   :  { %v716_v41 = vadd.f32 1.0, %v1274_v40 }
 0xa4e   :  { %v1276_v42 = vpop.eup %1275 }
 0xa4f   :  { %1277 = vrcp.f32 %v716_v41  ;;  %v717_v43 = vadd.f32 1.0, %v1276_v42 }
 0xa51   :  { %1279 = vrcp.f32 %v717_v43 }
 0xa5c   :  { %v1278_v1 = vpop.eup %1277 }
 0xa5d   :  { %v731_v7 = vmul.f32 %v1278_v1, %v729_v44 }
 0xa5e   :  { %v1280_v45 = vpop.eup %1279 }
 0xa5f   :  { %v723_v47 = vmul.f32 2.0, %v1280_v45 }
 0xa61   :  { %v1133_v48 = vadd.f32 -1.0, %v723_v47 }
 0xa63   :  { %v727_v49 = vsel %vm329_vm1, %v1133_v48, %v1280_v45 }
 0xa64   :  { %v732_v50 = vmul.f32 %v1278_v1, %v727_v49 }
 0xa66   :  { %734 = vrot.lane.b32.xlu1 %v732_v50, %s1320_s4 }
 0xad8   :  { %v735_v51 = vpop.permute.xlu1 %734 }
 0xad9   :  { %v737_v52 = vadd.f32 %v735_v51, %v731_v7 }
 0xadb   :  { %1281 = vtanh.f32 %v737_v52 }
 0xae8   :  { %v1282_v53 = vpop.eup %1281 }
 0xae9   :  { %v1584_v54 = vmul.f32 %v1282_v53, %v727_v49 }
 0xaeb   :  { %v740_v55 = vpack.c.bf16 %v1584_v54, %v1584_v54 }
 0xaed   :  { %742 = vrot.lane.b32.xlu0 %v740_v55, %s1320_s4 }
 0xb5f   :  { %v743_v56 = vpop.permute.xlu0 %742 }
 0xb60   :  { %1134 = vmatmul.mubr.msk.bf16.vlgmr.msra.gmra.mxu1 %vm270_vm0, %v743_v56 }
 0xb61   :  { %930 = vmatpush1.bf16.msra.mxu1 %v1449_v24  ;;  %953 = vmatprep.mubr.bf16.mxu1 %v1317_v9 }
 0xb62   :  { %931 = vmatprep.subr.bf16.mxu1 %v1455_v25 }
 0xb65   :  { %932 = vmatpush1.bf16.msra.mxu1 %v1462_v26 }
 0xb66   :  { %933 = vmatprep.subr.bf16.mxu1 %v1469_v27 }
 0xb69   :  { %934 = vmatpush1.bf16.msra.mxu1 %v1476_v28 }
 0xb6a   :  { %935 = vmatprep.subr.bf16.mxu1 %v1483_v29 }
 0xb6d   :  { %936 = vmatpush1.bf16.msra.mxu1 %v1490_v30  ;;  %v815_v30 = vrot.slane %v737_v52, 6 }
 0xc20   :  { %v781_v57 = vpop.f32.mrf.mxu1 }
 0xc21   :  { %v790_v58 = vrot.slane %v781_v57, 6 }
 0xc22   :  { %v783_v59 = vpop.f32.mrf.mxu1 }
 0xc23   :  { %v794_v61 = vadd.f32 %v790_v58, %v1432_v10  ;;  %v791_v24 = vrot.slane %v783_v59, 6 }
 0xc24   :  { %v785_v62 = vpop.f32.mrf.mxu1 }
 0xc25   :  { %v1135_v9 = vmul.f32 -1.442695, %v794_v61  ;;  %v795_v25 = vadd.f32 %v791_v24, %v1577_v31  ;;  %v1012_v61 = vrot.slane %v1519_v0, 2  ;;  %v1023_v24 = vrot.slane %v1541_v46, 4 }
 0xc26   :  { %v786_v63 = vpop.f32.mrf.mxu1 }
 0xc27   :  { %1283 = vpow2.f32 %v1135_v9  ;;  %v1136_v26 = vmul.f32 -1.442695, %v795_v25 }
 0xc29   :  { %1285 = vpow2.f32 %v1136_v26 }
 0xc34   :  { %v1284_v27 = vpop.eup %1283 }
 0xc35   :  { %v802_v28 = vadd.f32 1.0, %v1284_v27 }
 0xc36   :  { %v1286_v2 = vpop.eup %1285 }
 0xc37   :  { %1287 = vrcp.f32 %v802_v28  ;;  %v803_v29 = vadd.f32 1.0, %v1286_v2 }
 0xc39   :  { %1289 = vrcp.f32 %v803_v29 }
 0xc44   :  { %v1288_v23 = vpop.eup %1287 }
 0xc45   :  { %v817_v4 = vmul.f32 %v1288_v23, %v815_v30 }
 0xc46   :  { %v1290_v6 = vpop.eup %1289 }
 0xc47   :  { %v809_v8 = vmul.f32 2.0, %v1290_v6 }
 0xc49   :  { %v1138_v3 = vadd.f32 -1.0, %v809_v8 }
 0xc4b   :  { %v813_v11 = vsel %vm329_vm1, %v1138_v3, %v1290_v6 }
 0xc4c   :  { %v818_v13 = vmul.f32 %v1288_v23, %v813_v11 }
 0xc4e   :  { %820 = vrot.lane.b32.xlu1 %v818_v13, %s1320_s4 }
 0xcc0   :  { %v821_v5 = vpop.permute.xlu1 %820 }
 0xcc1   :  { %v823_v14 = vadd.f32 %v821_v5, %v817_v4 }
 0xcc3   :  { %1291 = vtanh.f32 %v823_v14  ;;  %v902_v7 = vrot.slane %v823_v14, 6 }
 0xcd0   :  { %v1292_v15 = vpop.eup %1291 }
 0xcd1   :  { %v1603_v17 = vmul.f32 %v1292_v15, %v813_v11 }
 0xcd3   :  { %v826_v19 = vpack.c.bf16 %v1603_v17, %v1603_v17 }
 0xcd5   :  { %v828_v20 = vrot.slane %v826_v19, 1 }
 0xcd7   :  { %829 = vrot.lane.b32.xlu0 %v828_v20, %s1320_s4 }
 0xd49   :  { %v830_v21 = vpop.permute.xlu0 %829 }
 0xd4a   :  { %1139 = vmatmul.mubr.msk.bf16.vlgmr.msra.gmra.mxu0 %vm270_vm0, %v830_v21 }
 0xe0a   :  { %v868_v22 = vpop.f32.mrf.mxu0 }
 0xe0b   :  { %v877_v32 = vrot.slane %v868_v22, 4 }
 0xe0c   :  { %v870_v33 = vpop.f32.mrf.mxu0 }
 0xe0d   :  { %v881_v34 = vadd.f32 %v877_v32, %v1432_v10  ;;  %v878_v36 = vrot.slane %v870_v33, 4 }
 0xe0e   :  { %v872_v37 = vpop.f32.mrf.mxu0 }
 0xe0f   :  { %v1140_v38 = vmul.f32 -1.442695, %v881_v34  ;;  %v882_v39 = vadd.f32 %v878_v36, %v1577_v31  ;;  %v1028_v36 = vrot.slane %v1603_v17, 2 }
 0xe10   :  { %v873_v40 = vpop.f32.mrf.mxu0 }
 0xe11   :  { %1293 = vpow2.f32 %v1140_v38  ;;  %v1141_v41 = vmul.f32 -1.442695, %v882_v39 }
 0xe13   :  { %1295 = vpow2.f32 %v1141_v41  ;;  %v1041_v41 = vrot.slane %v1561_v18, 6 }
 0xe1e   :  { %v1294_v42 = vpop.eup %1293 }
 0xe1f   :  { %v889_v43 = vadd.f32 1.0, %v1294_v42 }
 0xe20   :  { %v1296_v44 = vpop.eup %1295 }
 0xe21   :  { %1297 = vrcp.f32 %v889_v43  ;;  %v890_v1 = vadd.f32 1.0, %v1296_v44 }
 0xe23   :  { %1299 = vrcp.f32 %v890_v1 }
 0xe2e   :  { %v1298_v45 = vpop.eup %1297 }
 0xe2f   :  { %v904_v47 = vmul.f32 %v1298_v45, %v902_v7 }
 0xe30   :  { %v1300_v48 = vpop.eup %1299 }
 0xe31   :  { %v896_v49 = vmul.f32 2.0, %v1300_v48 }
 0xe33   :  { %v1143_v50 = vadd.f32 -1.0, %v896_v49 }
 0xe35   :  { %v900_v51 = vsel %vm329_vm1, %v1143_v50, %v1300_v48 }
 0xe36   :  { %v905_v52 = vmul.f32 %v1298_v45, %v900_v51  ;;  %v1321_v45 = vmov 1983009808  }
 0xe38   :  { %907 = vrot.lane.b32.xlu1 %v905_v52, %s1320_s4 }
 0xeaa   :  { %v908_v53 = vpop.permute.xlu1 %907 }
 0xeab   :  { %v910_v55 = vadd.f32 %v908_v53, %v904_v47  ;;  %v1066_v47 = vunpack.c.l.s4 %v1321_v45 }
 0xead   :  { %1301 = vtanh.f32 %v910_v55  ;;  %v989_v6 = vrot.slane %v910_v55, 6  ;;  %v1067_v49 = vunpack.c.0.s8 %v1066_v47 }
 0xeba   :  { %v1302_v56 = vpop.eup %1301 }
 0xebb   :  { %v912_v57 = vmul.f32 %v1302_v56, %v900_v51  ;;  %v1070_v51 = vsub.s32 %v1067_v49, %v1416_v60 }
 0xebd   :  { %v913_v58 = vpack.c.bf16 %v912_v57, %v912_v57  ;;  %v1017_v14 = vrot.slane %v912_v57, 4 }
 0xebf   :  { %v915_v59 = vrot.slane %v913_v58, 2 }
 0xec1   :  { %916 = vrot.lane.b32.xlu0 %v915_v59, %s1320_s4 }
 0xec5   :  { %1002 = vrot.lane.b32.xlu0 %v1499_v35, %s1320_s4 }
 0xec9   :  { %1013 = vrot.lane.b32.xlu0 %v1012_v61, %s1320_s4 }
 0xecd   :  { %1024 = vrot.lane.b32.xlu0 %v1023_v24, %s1320_s4 }
 0xf33   :  { %v917_v62 = vpop.permute.xlu0 %916 }
 0xf34   :  { %1144 = vmatmul.mubr.msk.bf16.vlgmr.msra.gmra.mxu1 %vm270_vm0, %v917_v62 }
 0xf37   :  { %v1003_v15 = vpop.permute.xlu0 %1002 }
 0xf3b   :  { %v1014_v21 = vpop.permute.xlu0 %1013 }
 0xf3f   :  { %v1025_v38 = vpop.permute.xlu0 %1024 }
 0xff4   :  { %v955_v9 = vpop.f32.mrf.mxu1 }
 0xff5   :  { %v964_v25 = vrot.slane %v955_v9, 2 }
 0xff6   :  { %v957_v63 = vpop.f32.mrf.mxu1 }
 0xff7   :  { %v968_v26 = vadd.f32 %v964_v25, %v1432_v10  ;;  %v965_v27 = vrot.slane %v957_v63, 2 }
 0xff8   :  { %v959_v28 = vpop.f32.mrf.mxu1 }
 0xff9   :  { %v1145_v2 = vmul.f32 -1.442695, %v968_v26  ;;  %v969_v35 = vadd.f32 %v965_v27, %v1577_v31 }
 0xffa   :  { %v960_v0 = vpop.f32.mrf.mxu1 }
 0xffb   :  { %1303 = vpow2.f32 %v1145_v2  ;;  %v1146_v29 = vmul.f32 -1.442695, %v969_v35 }
 0xffd   :  { %1305 = vpow2.f32 %v1146_v29 }
0x1008   :  { %v1304_v46 = vpop.eup %1303 }
0x1009   :  { %v976_v30 = vadd.f32 1.0, %v1304_v46 }
0x100a   :  { %v1306_v23 = vpop.eup %1305 }
0x100b   :  { %1307 = vrcp.f32 %v976_v30  ;;  %v977_v4 = vadd.f32 1.0, %v1306_v23 }
0x100d   :  { %1309 = vrcp.f32 %v977_v4 }
0x1018   :  { %v1308_v8 = vpop.eup %1307 }
0x1019   :  { %v991_v3 = vmul.f32 %v1308_v8, %v989_v6 }
0x101a   :  { %v1310_v11 = vpop.eup %1309 }
0x101b   :  { %v983_v10 = vmul.f32 2.0, %v1310_v11 }
0x101d   :  { %v1148_v13 = vadd.f32 -1.0, %v983_v10 }
0x101f   :  { %v987_v5 = vsel %vm329_vm1, %v1148_v13, %v1310_v11 }
0x1020   :  { %v992_v31 = vmul.f32 %v1308_v8, %v987_v5 }
0x1022   :  { %994 = vrot.lane.b32.xlu1 %v992_v31, %s1320_s4 }
0x1026   :  { %1018 = vrot.lane.b32.xlu1 %v1017_v14, %s1320_s4 }
0x1094   :  { %v995_v19 = vpop.permute.xlu1 %994 }
0x1095   :  { %v997_v20 = vadd.f32 %v995_v19, %v991_v3 }
0x1097   :  { %1311 = vtanh.f32 %v997_v20 }
0x1098   :  { %v1019_v22 = vpop.permute.xlu1 %1018 }
0x1099   :  { %v1021_v32 = vsel %vm1000_vm2, %v1014_v21, %v1019_v22  ;;  %v1034_v50 = vsel %vm1000_vm2, %v1019_v22, %v1014_v21 }
0x109a   :  { %1037 = vrot.lane.b32.xlu0 %v1021_v32, %s1320_s4 }
0x10a4   :  { %v1312_v16 = vpop.eup %1311 }
0x10a5   :  { %v999_v33 = vmul.f32 %v1312_v16, %v987_v5 }
0x10a7   :  { %v1006_v34 = vrot.slane %v999_v33, 6 }
0x10a9   :  { %1007 = vrot.lane.b32.xlu1 %v1006_v34, %s1320_s4 }
0x10ad   :  { %1029 = vrot.lane.b32.xlu1 %v1028_v36, %s1320_s4 }
0x10b1   :  { %1044 = vrot.lane.b32.xlu1 %v1584_v54, %s1320_s4 }
0x110c   :  { %v1038_v43 = vpop.permute.xlu0 %1037 }
0x111b   :  { %v1008_v37 = vpop.permute.xlu1 %1007 }
0x111c   :  { %v1035_v39 = vsel %vm1000_vm2, %v1008_v37, %v1003_v15  ;;  %v1010_v40 = vsel %vm1000_vm2, %v1003_v15, %v1008_v37 }
0x111d   :  { %1052 = vrot.lane.b32.xlu1 %v1035_v39, %s1320_s4  ;;  %v1055_v44 = vsel %vm270_vm0, %v1010_v40, %v1038_v43 }
0x111f   :  { %v1030_v42 = vpop.permute.xlu1 %1029 }
0x1120   :  { %v1032_v17 = vsel %vm1000_vm2, %v1025_v38, %v1030_v42  ;;  %v1033_v54 = vsel %vm1000_vm2, %v1030_v42, %v1025_v38 }
0x1121   :  { %v1056_v1 = vsel %vm270_vm0, %v1032_v17, %v1041_v41  ;;  %1048 = vrot.lane.b32.xlu0 %v1033_v54, %s1320_s4 }
0x1122   :  { %v1063_v7 = vcombine.low %v1055_v44, %v1056_v1 }
0x1123   :  { %v1045_v48 = vpop.permute.xlu1 %1044 }
0x1124   :  { %v1071_v57 = vrot.slane %v1063_v7, %v1070_v51 }
0x118f   :  { %v1053_v18 = vpop.permute.xlu1 %1052 }
0x1190   :  { %v1058_v53 = vsel %vm270_vm0, %v1034_v50, %v1053_v18 }
0x1193   :  { %v1049_v52 = vpop.permute.xlu0 %1048 }
0x1194   :  { %v1057_v55 = vsel %vm270_vm0, %v1045_v48, %v1049_v52 }
0x1195   :  { %v1064_v56 = vcombine.low %v1057_v55, %v1058_v53 }
0x1197   :  { %v1078_v58 = vrot.slane %v1064_v56, %v1070_v51 }
0x1199   :  { %v1079_v59 = vcombine.low %v1071_v57, %v1078_v58 }
0x119b   :  { %1081 = vst [vmem:[%s1664_s6] sm:$0xff] %v1079_v59 }

</bundles_post_ra>
